<compile_context>
chip_gen: v7x
topology: tpu7x:2x2x1
jax: 0.10.0
libtpu: 0.0.40
codegen_flags: <defaults>
</compile_context>

<pallas_src>
import jax
import jax.numpy as jnp
from jax import lax
from jax.experimental import pallas as pl
from jax.experimental.pallas import tpu as pltpu


def lstm_linear_kernel(x_ref, wih_ref, whh_ref, b_ref, wout_ref, bout_ref,
                       out_ref):
    H = whh_ref.shape[0]          # hidden size
    T = x_ref.shape[0]            # static seq length

    # Hoisted input projection (+ fused bias): one (T, in) @ (in, 4H) matmul.
    xw = (jnp.dot(x_ref[...], wih_ref[...], preferred_element_type=jnp.float32)
          + b_ref[...])                                     # (T, 4H)

    # Fused-activation constants: i/f/o lanes get 0.5*tanh + 0.5 (== sigmoid of
    # the unscaled pre-activation, since the weights were pre-scaled by 0.5),
    # g lanes get plain tanh.  Built once, outside the recurrence.
    lane = lax.broadcasted_iota(jnp.int32, (1, 4 * H), 1)
    is_g = (lane >= 2 * H) & (lane < 3 * H)
    act_scale = jnp.where(is_g, 1.0, 0.5).astype(jnp.float32)
    act_off = jnp.where(is_g, 0.0, 0.5).astype(jnp.float32)

    whh = whh_ref[...]                                      # (H, 4H), kept in vregs

    h = jnp.zeros((1, H), jnp.float32)
    c = jnp.zeros((1, H), jnp.float32)

    # Fully unrolled recurrence (T is a trace-time constant).
    for t in range(T):
        gates = xw[t:t + 1, :] + jnp.dot(h, whh,
                                         preferred_element_type=jnp.float32)
        act = jnp.tanh(gates) * act_scale + act_off         # one EUP pass / step
        i = act[:, 0 * H:1 * H]
        f = act[:, 1 * H:2 * H]
        g = act[:, 2 * H:3 * H]
        o = act[:, 3 * H:4 * H]
        c = f * c + i * g
        h = o * jnp.tanh(c)

    # Final Linear on the last hidden state.
    out_ref[...] = (
        jnp.dot(h, wout_ref[...], preferred_element_type=jnp.float32)
        + bout_ref[...]
    )


def lstm_linear_forward(x, w_ih, w_hh, b_ih, b_hh, w_out, b_out,
                        input_size, hidden_size, output_size):
    """x: any shape with total elements = seq_len * input_size (mirrors PyTorch
    x.view(-1, 1, input_size)).  Returns (1, output_size)."""
    x2d = x.reshape(-1, input_size).astype(jnp.float32)     # (seq_len, input_size)
    H = hidden_size

    # Pre-scale i/f/o gate columns by 0.5 so the in-kernel activation can be a
    # single tanh (sigmoid(z) = 0.5*tanh(z/2) + 0.5).  g columns untouched.
    gate_scale = jnp.concatenate([
        jnp.full((H,), 0.5, jnp.float32),   # i
        jnp.full((H,), 0.5, jnp.float32),   # f
        jnp.ones((H,), jnp.float32),        # g
        jnp.full((H,), 0.5, jnp.float32),   # o
    ])                                                       # (4H,)

    wih_t = w_ih.T.astype(jnp.float32) * gate_scale[None, :]         # (in, 4H)
    whh_t = w_hh.T.astype(jnp.float32) * gate_scale[None, :]         # (H, 4H)
    b_gates = ((b_ih + b_hh).astype(jnp.float32) * gate_scale).reshape(1, 4 * H)
    wout_t = w_out.T.astype(jnp.float32)                              # (H, out)
    b_out2d = b_out.astype(jnp.float32).reshape(1, output_size)       # (1, out)

    vmem = pl.BlockSpec(memory_space=pltpu.MemorySpace.VMEM)
    return pl.pallas_call(
        lstm_linear_kernel,
        out_shape=jax.ShapeDtypeStruct((1, output_size), jnp.float32),
        in_specs=[vmem] * 6,
        out_specs=vmem,
    )(x2d, wih_t, whh_t, b_gates, wout_t, b_out2d)


def reference_forward(x, w_ih, w_hh, b_ih, b_hh, w_out, b_out,
                      input_size, hidden_size):
    """Pure-JAX reference (PyTorch LSTM semantics, gate order i,f,g,o)."""
    xs = x.reshape(-1, input_size).astype(jnp.float32)
    H = hidden_size
    h = jnp.zeros((hidden_size,), jnp.float32)
    c = jnp.zeros((hidden_size,), jnp.float32)
    for t in range(xs.shape[0]):
        gates = w_ih @ xs[t] + b_ih + w_hh @ h + b_hh
        i = jax.nn.sigmoid(gates[0 * H:1 * H])
        f = jax.nn.sigmoid(gates[1 * H:2 * H])
        g = jnp.tanh(gates[2 * H:3 * H])
        o = jax.nn.sigmoid(gates[3 * H:4 * H])
        c = f * c + i * g
        h = o * jnp.tanh(c)
    return (w_out @ h + b_out)[None, :]


if __name__ == "__main__":
    input_size, hidden_size, output_size = 32, 32, 16
    seq_len = 8

    key = jax.random.PRNGKey(0)
    k_x, k_wih, k_whh, k_bih, k_bhh, k_wo, k_bo = jax.random.split(key, 7)

    # x: the module flattens to (-1, 1, input_size); give it (seq_len, input_size).
    x = jax.random.normal(k_x, (seq_len, input_size), jnp.float32)

    scale = 0.1
    w_ih = scale * jax.random.normal(k_wih, (4 * hidden_size, input_size), jnp.float32)
    w_hh = scale * jax.random.normal(k_whh, (4 * hidden_size, hidden_size), jnp.float32)
    b_ih = scale * jax.random.normal(k_bih, (4 * hidden_size,), jnp.float32)
    b_hh = scale * jax.random.normal(k_bhh, (4 * hidden_size,), jnp.float32)
    w_out = scale * jax.random.normal(k_wo, (output_size, hidden_size), jnp.float32)
    b_out = scale * jax.random.normal(k_bo, (output_size,), jnp.float32)

    out = lstm_linear_forward(x, w_ih, w_hh, b_ih, b_hh, w_out, b_out,
                              input_size, hidden_size, output_size)
    out = jax.block_until_ready(out)

    ref = reference_forward(x, w_ih, w_hh, b_ih, b_hh, w_out, b_out,
                            input_size, hidden_size)
    assert out.shape == (1, output_size)
    assert jnp.allclose(out, ref, atol=2e-5, rtol=2e-5), (out, ref)

    print("KERNEL_OK")
</pallas_src>

<mosaic_0001>
module attributes {stable_mosaic.version = 11 : i64} {
  func.func @lstm_linear_kernel(%arg0: memref<8x32xf32, #tpu.memory_space<vmem>>, %arg1: memref<32x128xf32, #tpu.memory_space<vmem>>, %arg2: memref<32x128xf32, #tpu.memory_space<vmem>>, %arg3: memref<1x128xf32, #tpu.memory_space<vmem>>, %arg4: memref<32x16xf32, #tpu.memory_space<vmem>>, %arg5: memref<1x16xf32, #tpu.memory_space<vmem>>, %arg6: memref<1x16xf32, #tpu.memory_space<vmem>>) attributes {dimension_semantics = [], scalar_prefetch = 0 : i64, scratch_operands = 0 : i64, tpu.core_type = #tpu.core_type<tc>} {
    %c0 = arith.constant 0 : index
    %c0_0 = arith.constant 0 : index
    %0 = vector.load %arg0[%c0, %c0_0] : memref<8x32xf32, #tpu.memory_space<vmem>>, vector<8x32xf32>
    %c0_1 = arith.constant 0 : index
    %c0_2 = arith.constant 0 : index
    %1 = vector.load %arg1[%c0_1, %c0_2] : memref<32x128xf32, #tpu.memory_space<vmem>>, vector<32x128xf32>
    %cst = arith.constant dense<0.000000e+00> : vector<8x128xf32>
    %2 = tpu.matmul %0, %1, %cst {dimension_numbers = #tpu.dot_dimension_numbers<[1], [0], [0], [1], [0, 0, 1, 1], [], []>} : vector<8x32xf32>, vector<32x128xf32>, vector<8x128xf32> -> vector<8x128xf32>
    %c0_3 = arith.constant 0 : index
    %c0_4 = arith.constant 0 : index
    %3 = vector.load %arg3[%c0_3, %c0_4] : memref<1x128xf32, #tpu.memory_space<vmem>>, vector<1x128xf32>
    %4 = vector.broadcast %3 : vector<1x128xf32> to vector<8x128xf32>
    %5 = arith.addf %2, %4 : vector<8x128xf32>
    %6 = tpu.iota {dimensions = array<i32: 1>} : vector<1x128xi32>
    %c64_i32 = arith.constant 64 : i32
    %7 = vector.broadcast %c64_i32 : i32 to vector<1x128xi32>
    %8 = arith.cmpi sge, %6, %7 : vector<1x128xi32>
    %c96_i32 = arith.constant 96 : i32
    %9 = vector.broadcast %c96_i32 : i32 to vector<1x128xi32>
    %10 = arith.cmpi slt, %6, %9 : vector<1x128xi32>
    %11 = arith.andi %8, %10 : vector<1x128xi1>
    %cst_5 = arith.constant 1.000000e+00 : f32
    %cst_6 = arith.constant 5.000000e-01 : f32
    %12 = vector.broadcast %cst_5 : f32 to vector<1x128xf32>
    %13 = vector.broadcast %cst_6 : f32 to vector<1x128xf32>
    %14 = arith.select %11, %12, %13 : vector<1x128xi1>, vector<1x128xf32>
    %cst_7 = arith.constant 0.000000e+00 : f32
    %cst_8 = arith.constant 5.000000e-01 : f32
    %15 = vector.broadcast %cst_7 : f32 to vector<1x128xf32>
    %16 = vector.broadcast %cst_8 : f32 to vector<1x128xf32>
    %17 = arith.select %11, %15, %16 : vector<1x128xi1>, vector<1x128xf32>
    %c0_9 = arith.constant 0 : index
    %c0_10 = arith.constant 0 : index
    %18 = vector.load %arg2[%c0_9, %c0_10] : memref<32x128xf32, #tpu.memory_space<vmem>>, vector<32x128xf32>
    %cst_11 = arith.constant 0.000000e+00 : f32
    %19 = vector.broadcast %cst_11 : f32 to vector<1x32xf32>
    %cst_12 = arith.constant 0.000000e+00 : f32
    %20 = vector.broadcast %cst_12 : f32 to vector<1x32xf32>
    %21 = vector.extract_strided_slice %5 {offsets = [0, 0], sizes = [1, 128], strides = [1, 1]} : vector<8x128xf32> to vector<1x128xf32>
    %cst_13 = arith.constant dense<0.000000e+00> : vector<1x128xf32>
    %22 = tpu.matmul %19, %18, %cst_13 {dimension_numbers = #tpu.dot_dimension_numbers<[1], [0], [0], [1], [0, 0, 1, 1], [], []>} : vector<1x32xf32>, vector<32x128xf32>, vector<1x128xf32> -> vector<1x128xf32>
    %23 = arith.addf %21, %22 : vector<1x128xf32>
    %24 = math.tanh %23 : vector<1x128xf32>
    %25 = arith.mulf %24, %14 : vector<1x128xf32>
    %26 = arith.addf %25, %17 : vector<1x128xf32>
    %27 = vector.extract_strided_slice %26 {offsets = [0, 0], sizes = [1, 32], strides = [1, 1]} : vector<1x128xf32> to vector<1x32xf32>
    %28 = vector.extract_strided_slice %26 {offsets = [0, 32], sizes = [1, 32], strides = [1, 1]} : vector<1x128xf32> to vector<1x32xf32>
    %29 = vector.extract_strided_slice %26 {offsets = [0, 64], sizes = [1, 32], strides = [1, 1]} : vector<1x128xf32> to vector<1x32xf32>
    %30 = vector.extract_strided_slice %26 {offsets = [0, 96], sizes = [1, 32], strides = [1, 1]} : vector<1x128xf32> to vector<1x32xf32>
    %31 = arith.mulf %28, %20 : vector<1x32xf32>
    %32 = arith.mulf %27, %29 : vector<1x32xf32>
    %33 = arith.addf %31, %32 : vector<1x32xf32>
    %34 = math.tanh %33 : vector<1x32xf32>
    %35 = arith.mulf %30, %34 : vector<1x32xf32>
    %36 = vector.extract_strided_slice %5 {offsets = [1, 0], sizes = [1, 128], strides = [1, 1]} : vector<8x128xf32> to vector<1x128xf32>
    %cst_14 = arith.constant dense<0.000000e+00> : vector<1x128xf32>
    %37 = tpu.matmul %35, %18, %cst_14 {dimension_numbers = #tpu.dot_dimension_numbers<[1], [0], [0], [1], [0, 0, 1, 1], [], []>} : vector<1x32xf32>, vector<32x128xf32>, vector<1x128xf32> -> vector<1x128xf32>
    %38 = arith.addf %36, %37 : vector<1x128xf32>
    %39 = math.tanh %38 : vector<1x128xf32>
    %40 = arith.mulf %39, %14 : vector<1x128xf32>
    %41 = arith.addf %40, %17 : vector<1x128xf32>
    %42 = vector.extract_strided_slice %41 {offsets = [0, 0], sizes = [1, 32], strides = [1, 1]} : vector<1x128xf32> to vector<1x32xf32>
    %43 = vector.extract_strided_slice %41 {offsets = [0, 32], sizes = [1, 32], strides = [1, 1]} : vector<1x128xf32> to vector<1x32xf32>
    %44 = vector.extract_strided_slice %41 {offsets = [0, 64], sizes = [1, 32], strides = [1, 1]} : vector<1x128xf32> to vector<1x32xf32>
    %45 = vector.extract_strided_slice %41 {offsets = [0, 96], sizes = [1, 32], strides = [1, 1]} : vector<1x128xf32> to vector<1x32xf32>
    %46 = arith.mulf %43, %33 : vector<1x32xf32>
    %47 = arith.mulf %42, %44 : vector<1x32xf32>
    %48 = arith.addf %46, %47 : vector<1x32xf32>
    %49 = math.tanh %48 : vector<1x32xf32>
    %50 = arith.mulf %45, %49 : vector<1x32xf32>
    %51 = vector.extract_strided_slice %5 {offsets = [2, 0], sizes = [1, 128], strides = [1, 1]} : vector<8x128xf32> to vector<1x128xf32>
    %cst_15 = arith.constant dense<0.000000e+00> : vector<1x128xf32>
    %52 = tpu.matmul %50, %18, %cst_15 {dimension_numbers = #tpu.dot_dimension_numbers<[1], [0], [0], [1], [0, 0, 1, 1], [], []>} : vector<1x32xf32>, vector<32x128xf32>, vector<1x128xf32> -> vector<1x128xf32>
    %53 = arith.addf %51, %52 : vector<1x128xf32>
    %54 = math.tanh %53 : vector<1x128xf32>
    %55 = arith.mulf %54, %14 : vector<1x128xf32>
    %56 = arith.addf %55, %17 : vector<1x128xf32>
    %57 = vector.extract_strided_slice %56 {offsets = [0, 0], sizes = [1, 32], strides = [1, 1]} : vector<1x128xf32> to vector<1x32xf32>
    %58 = vector.extract_strided_slice %56 {offsets = [0, 32], sizes = [1, 32], strides = [1, 1]} : vector<1x128xf32> to vector<1x32xf32>
    %59 = vector.extract_strided_slice %56 {offsets = [0, 64], sizes = [1, 32], strides = [1, 1]} : vector<1x128xf32> to vector<1x32xf32>
    %60 = vector.extract_strided_slice %56 {offsets = [0, 96], sizes = [1, 32], strides = [1, 1]} : vector<1x128xf32> to vector<1x32xf32>
    %61 = arith.mulf %58, %48 : vector<1x32xf32>
    %62 = arith.mulf %57, %59 : vector<1x32xf32>
    %63 = arith.addf %61, %62 : vector<1x32xf32>
    %64 = math.tanh %63 : vector<1x32xf32>
    %65 = arith.mulf %60, %64 : vector<1x32xf32>
    %66 = vector.extract_strided_slice %5 {offsets = [3, 0], sizes = [1, 128], strides = [1, 1]} : vector<8x128xf32> to vector<1x128xf32>
    %cst_16 = arith.constant dense<0.000000e+00> : vector<1x128xf32>
    %67 = tpu.matmul %65, %18, %cst_16 {dimension_numbers = #tpu.dot_dimension_numbers<[1], [0], [0], [1], [0, 0, 1, 1], [], []>} : vector<1x32xf32>, vector<32x128xf32>, vector<1x128xf32> -> vector<1x128xf32>
    %68 = arith.addf %66, %67 : vector<1x128xf32>
    %69 = math.tanh %68 : vector<1x128xf32>
    %70 = arith.mulf %69, %14 : vector<1x128xf32>
    %71 = arith.addf %70, %17 : vector<1x128xf32>
    %72 = vector.extract_strided_slice %71 {offsets = [0, 0], sizes = [1, 32], strides = [1, 1]} : vector<1x128xf32> to vector<1x32xf32>
    %73 = vector.extract_strided_slice %71 {offsets = [0, 32], sizes = [1, 32], strides = [1, 1]} : vector<1x128xf32> to vector<1x32xf32>
    %74 = vector.extract_strided_slice %71 {offsets = [0, 64], sizes = [1, 32], strides = [1, 1]} : vector<1x128xf32> to vector<1x32xf32>
    %75 = vector.extract_strided_slice %71 {offsets = [0, 96], sizes = [1, 32], strides = [1, 1]} : vector<1x128xf32> to vector<1x32xf32>
    %76 = arith.mulf %73, %63 : vector<1x32xf32>
    %77 = arith.mulf %72, %74 : vector<1x32xf32>
    %78 = arith.addf %76, %77 : vector<1x32xf32>
    %79 = math.tanh %78 : vector<1x32xf32>
    %80 = arith.mulf %75, %79 : vector<1x32xf32>
    %81 = vector.extract_strided_slice %5 {offsets = [4, 0], sizes = [1, 128], strides = [1, 1]} : vector<8x128xf32> to vector<1x128xf32>
    %cst_17 = arith.constant dense<0.000000e+00> : vector<1x128xf32>
    %82 = tpu.matmul %80, %18, %cst_17 {dimension_numbers = #tpu.dot_dimension_numbers<[1], [0], [0], [1], [0, 0, 1, 1], [], []>} : vector<1x32xf32>, vector<32x128xf32>, vector<1x128xf32> -> vector<1x128xf32>
    %83 = arith.addf %81, %82 : vector<1x128xf32>
    %84 = math.tanh %83 : vector<1x128xf32>
    %85 = arith.mulf %84, %14 : vector<1x128xf32>
    %86 = arith.addf %85, %17 : vector<1x128xf32>
    %87 = vector.extract_strided_slice %86 {offsets = [0, 0], sizes = [1, 32], strides = [1, 1]} : vector<1x128xf32> to vector<1x32xf32>
    %88 = vector.extract_strided_slice %86 {offsets = [0, 32], sizes = [1, 32], strides = [1, 1]} : vector<1x128xf32> to vector<1x32xf32>
    %89 = vector.extract_strided_slice %86 {offsets = [0, 64], sizes = [1, 32], strides = [1, 1]} : vector<1x128xf32> to vector<1x32xf32>
    %90 = vector.extract_strided_slice %86 {offsets = [0, 96], sizes = [1, 32], strides = [1, 1]} : vector<1x128xf32> to vector<1x32xf32>
    %91 = arith.mulf %88, %78 : vector<1x32xf32>
    %92 = arith.mulf %87, %89 : vector<1x32xf32>
    %93 = arith.addf %91, %92 : vector<1x32xf32>
    %94 = math.tanh %93 : vector<1x32xf32>
    %95 = arith.mulf %90, %94 : vector<1x32xf32>
    %96 = vector.extract_strided_slice %5 {offsets = [5, 0], sizes = [1, 128], strides = [1, 1]} : vector<8x128xf32> to vector<1x128xf32>
    %cst_18 = arith.constant dense<0.000000e+00> : vector<1x128xf32>
    %97 = tpu.matmul %95, %18, %cst_18 {dimension_numbers = #tpu.dot_dimension_numbers<[1], [0], [0], [1], [0, 0, 1, 1], [], []>} : vector<1x32xf32>, vector<32x128xf32>, vector<1x128xf32> -> vector<1x128xf32>
    %98 = arith.addf %96, %97 : vector<1x128xf32>
    %99 = math.tanh %98 : vector<1x128xf32>
    %100 = arith.mulf %99, %14 : vector<1x128xf32>
    %101 = arith.addf %100, %17 : vector<1x128xf32>
    %102 = vector.extract_strided_slice %101 {offsets = [0, 0], sizes = [1, 32], strides = [1, 1]} : vector<1x128xf32> to vector<1x32xf32>
    %103 = vector.extract_strided_slice %101 {offsets = [0, 32], sizes = [1, 32], strides = [1, 1]} : vector<1x128xf32> to vector<1x32xf32>
    %104 = vector.extract_strided_slice %101 {offsets = [0, 64], sizes = [1, 32], strides = [1, 1]} : vector<1x128xf32> to vector<1x32xf32>
    %105 = vector.extract_strided_slice %101 {offsets = [0, 96], sizes = [1, 32], strides = [1, 1]} : vector<1x128xf32> to vector<1x32xf32>
    %106 = arith.mulf %103, %93 : vector<1x32xf32>
    %107 = arith.mulf %102, %104 : vector<1x32xf32>
    %108 = arith.addf %106, %107 : vector<1x32xf32>
    %109 = math.tanh %108 : vector<1x32xf32>
    %110 = arith.mulf %105, %109 : vector<1x32xf32>
    %111 = vector.extract_strided_slice %5 {offsets = [6, 0], sizes = [1, 128], strides = [1, 1]} : vector<8x128xf32> to vector<1x128xf32>
    %cst_19 = arith.constant dense<0.000000e+00> : vector<1x128xf32>
    %112 = tpu.matmul %110, %18, %cst_19 {dimension_numbers = #tpu.dot_dimension_numbers<[1], [0], [0], [1], [0, 0, 1, 1], [], []>} : vector<1x32xf32>, vector<32x128xf32>, vector<1x128xf32> -> vector<1x128xf32>
    %113 = arith.addf %111, %112 : vector<1x128xf32>
    %114 = math.tanh %113 : vector<1x128xf32>
    %115 = arith.mulf %114, %14 : vector<1x128xf32>
    %116 = arith.addf %115, %17 : vector<1x128xf32>
    %117 = vector.extract_strided_slice %116 {offsets = [0, 0], sizes = [1, 32], strides = [1, 1]} : vector<1x128xf32> to vector<1x32xf32>
    %118 = vector.extract_strided_slice %116 {offsets = [0, 32], sizes = [1, 32], strides = [1, 1]} : vector<1x128xf32> to vector<1x32xf32>
    %119 = vector.extract_strided_slice %116 {offsets = [0, 64], sizes = [1, 32], strides = [1, 1]} : vector<1x128xf32> to vector<1x32xf32>
    %120 = vector.extract_strided_slice %116 {offsets = [0, 96], sizes = [1, 32], strides = [1, 1]} : vector<1x128xf32> to vector<1x32xf32>
    %121 = arith.mulf %118, %108 : vector<1x32xf32>
    %122 = arith.mulf %117, %119 : vector<1x32xf32>
    %123 = arith.addf %121, %122 : vector<1x32xf32>
    %124 = math.tanh %123 : vector<1x32xf32>
    %125 = arith.mulf %120, %124 : vector<1x32xf32>
    %126 = vector.extract_strided_slice %5 {offsets = [7, 0], sizes = [1, 128], strides = [1, 1]} : vector<8x128xf32> to vector<1x128xf32>
    %cst_20 = arith.constant dense<0.000000e+00> : vector<1x128xf32>
    %127 = tpu.matmul %125, %18, %cst_20 {dimension_numbers = #tpu.dot_dimension_numbers<[1], [0], [0], [1], [0, 0, 1, 1], [], []>} : vector<1x32xf32>, vector<32x128xf32>, vector<1x128xf32> -> vector<1x128xf32>
    %128 = arith.addf %126, %127 : vector<1x128xf32>
    %129 = math.tanh %128 : vector<1x128xf32>
    %130 = arith.mulf %129, %14 : vector<1x128xf32>
    %131 = arith.addf %130, %17 : vector<1x128xf32>
    %132 = vector.extract_strided_slice %131 {offsets = [0, 0], sizes = [1, 32], strides = [1, 1]} : vector<1x128xf32> to vector<1x32xf32>
    %133 = vector.extract_strided_slice %131 {offsets = [0, 32], sizes = [1, 32], strides = [1, 1]} : vector<1x128xf32> to vector<1x32xf32>
    %134 = vector.extract_strided_slice %131 {offsets = [0, 64], sizes = [1, 32], strides = [1, 1]} : vector<1x128xf32> to vector<1x32xf32>
    %135 = vector.extract_strided_slice %131 {offsets = [0, 96], sizes = [1, 32], strides = [1, 1]} : vector<1x128xf32> to vector<1x32xf32>
    %136 = arith.mulf %133, %123 : vector<1x32xf32>
    %137 = arith.mulf %132, %134 : vector<1x32xf32>
    %138 = arith.addf %136, %137 : vector<1x32xf32>
    %139 = math.tanh %138 : vector<1x32xf32>
    %140 = arith.mulf %135, %139 : vector<1x32xf32>
    %c0_21 = arith.constant 0 : index
    %c0_22 = arith.constant 0 : index
    %141 = vector.load %arg4[%c0_21, %c0_22] : memref<32x16xf32, #tpu.memory_space<vmem>>, vector<32x16xf32>
    %cst_23 = arith.constant dense<0.000000e+00> : vector<1x16xf32>
    %142 = tpu.matmul %140, %141, %cst_23 {dimension_numbers = #tpu.dot_dimension_numbers<[1], [0], [0], [1], [0, 0, 1, 1], [], []>} : vector<1x32xf32>, vector<32x16xf32>, vector<1x16xf32> -> vector<1x16xf32>
    %c0_24 = arith.constant 0 : index
    %c0_25 = arith.constant 0 : index
    %143 = vector.load %arg5[%c0_24, %c0_25] : memref<1x16xf32, #tpu.memory_space<vmem>>, vector<1x16xf32>
    %144 = arith.addf %142, %143 : vector<1x16xf32>
    %c0_26 = arith.constant 0 : index
    %c0_27 = arith.constant 0 : index
    %145 = vector.load %arg6[%c0_26, %c0_27] : memref<1x16xf32, #tpu.memory_space<vmem>>, vector<1x16xf32>
    tpu.vector_store %arg6[%c0_26, %c0_27], %144 {strides = array<i32>} : memref<1x16xf32, #tpu.memory_space<vmem>>, vector<1x16xf32>,
    return
  }
}

</mosaic_0001>

<bundles_post_ra>
// kernel: tpu_custom_call.1
= control target key start
LH: loop header
LB: loop body
LE: loop exit
PB: predicated region body
PF: predicated region fallthrough
CT: control target
= control target key end

     0   :  { %11 = vsyncpa [#allocation3], 0  ;;  %s1601_s0 = inlined_call_operand.vmem [shape: f32[8,32], index: 0, kind: input, shape index: {}]   ;;  %s1602_s1 = inlined_call_operand.vmem [shape: f32[32,128], index: 1, kind: input, shape index: {}]   ;;  %s1603_s2 = inlined_call_operand.hbm [shape: f32[32,128], index: 2, kind: input, shape index: {}]   ;;  %s1604_s3 = inlined_call_operand.vmem [shape: f32[1,128], index: 3, kind: input, shape index: {}]   ;;  %s1605_s4 = inlined_call_operand.vmem [shape: f32[32,16], index: 4, kind: input, shape index: {}]   ;;  %s1606_s5 = inlined_call_operand.vmem [shape: f32[1,16], index: 5, kind: input, shape index: {}]   ;;  %s1607_s6 = inlined_call_operand.hbm [shape: f32[1,16], index: 6, kind: output, shape index: {}]  }
   0x1   :  { %12 = vsyncpa [#allocation4], 0  ;;  %s1367_s21 = smov [#allocation2]   ;;  %s1319_s25 = scalar_lea.hbm %s1603_s2, 512 }
   0x2   :  { %s22_s22 = sshll.u32 %s1367_s21, 4  ;;  %p1320_p0 = scmp.ne.s32.totalorder %s1603_s2, %s1319_s25  ;;  %s23_s22 = int_to_ptr.vmem [resolvable:$true] %s22_s22 }
   0x3   :  { %p1323_p1 = scmp.lt.u32.totalorder %s1319_s25, %s1603_s2 }
   0x5   :  { %p1325_p2 = pnand %p1323_p1, %p1320_p0 }
   0x7   :  { %1328 = shalt.err (!%p1325_p2)
}
   0x8   :  { %s1329_s30 = scalar_lea.vmem %s23_s22, 512  ;;  %p1334_p4 = scmp.lt.s32.totalorder %s23_s22, %s23_s22 }
   0x9   :  { %p1330_p3 = scmp.ne.s32.totalorder %s23_s22, %s1329_s30  ;;  %p1335_p5 = scmp.lt.s32.totalorder %s1329_s30, %s1329_s30 }
   0xb   :  { %p1336_p6 = por %p1335_p5, %p1334_p4 }
   0xd   :  { %p1337_p7 = pnand %p1336_p6, %p1330_p3 }
   0xf   :  { %1340 = shalt.err (!%p1337_p7)
}
  0x10   :  { %s1368_s7 = smov 128   ;;  %s1369_s8 = smov 8  }
  0x11   :  { %28 = dma.hbm_to_vmem [thread:$0]  %s1603_s2, 512, %s23_s22, [#allocation3], %s1368_s7, %s1368_s7, %s1369_s8  }
  0x12   :  { %1363 = dma.done.wait [#allocation3], 512  }
  0x13   :  { %1364 = vsyncadd [#allocation3], 4294966784  ;;  %v1370_v0 = vmov 0.0|0.0   ;;  %vm1371_vm0 = vmmov 0   ;;  %v1372_v1 = vmov 0.0   ;;  %v39_v2 = vld [vmem:[%s1602_s1] sm:$0xff]  ;;  %v124_v16 = vlaneseq }
  0x14   :  { %1217 = vmatprep.subr.bf16.mxu0 %v1370_v0  ;;  %1223 = vmatprep.subr.bf16.mxu1 %v1370_v0  ;;  %v40_v3 = vld [vmem:[%s1602_s1 + $0x8] sm:$0xff]  ;;  %v131_v4 = vld [vmem:[#allocation2] sm:$0xff]  ;;  %v41_v7 = vld [vmem:[%s1602_s1 + $0x10] sm:$0xff]  ;;  %vm50_vm1 = vcmask 261120   ;;  %v1373_v24 = vmov 0.5   ;;  %s1375_s20 = smov 32  }
  0x15   :  { %1115 = vmatprep.mubr.msk.f32.mxu0 %vm1371_vm0, %v1372_v1  ;;  %1126 = vmatprep.mubr.msk.f32.mxu1 %vm1371_vm0, %v1372_v1  ;;  %v1218_v5 = vpack.c.bf16 %v40_v3, %v39_v2  ;;  %v132_v6 = vld [vmem:[#allocation2 + $0x8] sm:$0xff]  ;;  %v42_v8 = vld [vmem:[%s1602_s1 + $0x18] sm:$0xff]  ;;  %v133_v10 = vld [vmem:[#allocation2 + $0x10] sm:$0xff]  ;;  %v125_v23 = vand.u32 127, %v124_v16  ;;  %vm1030_vm5 = vcmask 122880  }
  0x16   :  { %v1442_v9 = vpack.c.bf16 %v132_v6, %v131_v4  ;;  %v134_v11 = vld [vmem:[#allocation2 + $0x18] sm:$0xff]  ;;  %v1221_v12 = vpack.c.bf16 %v42_v8, %v41_v7  ;;  %v38_v14 = vld [vmem:[%s1601_s0] sm:$0xff] }
  0x17   :  { %1219 = vmatpush3.bf16.msra.mxu0 %v1218_v5  ;;  %v1446_v13 = vpack.c.bf16 %v134_v11, %v133_v10  ;;  %v1047_v15 = vld [vmem:[%s1604_s3] ss:$0 sm:$0xff]  ;;  %vm126_vm2 = vcmp.ge.s32.totalorder %v125_v23, 64  ;;  %vm127_vm3 = vcmp.lt.s32.totalorder %v125_v23, 96  ;;  %s1374_s3 = smov 64  }
  0x18   :  { %1225 = vmatpush3.bf16.msra.mxu1 %v1442_v9  ;;  %1220 = vmatprep.subr.bf16.mxu0 %v1370_v0  ;;  %vm128_vm4 = vmand %vm126_vm2, %vm127_vm3 }
  0x19   :  { %1226 = vmatprep.subr.bf16.mxu1 %v1370_v0  ;;  %v1475_v25 = vsel %vm128_vm4, 1.0, %v1373_v24  ;;  %v1477_v27 = vsel %vm128_vm4, 0.0, %v1373_v24 }
  0x1b   :  { %1222 = vmatpush3.bf16.msra.mxu0 %v1221_v12 }
  0x1c   :  { %1228 = vmatpush3.bf16.msra.mxu1 %v1446_v13  ;;  %1229 = vmatprep.subr.bf16.mxu0 %v1370_v0 }
  0x1d   :  { %1235 = vmatprep.subr.bf16.mxu1 %v1370_v0 }
  0x1e   :  { %1116 = vmatmul.mubr.msk.f32.vlgmr.msra.gmra.mrb[0].mxu0 %vm50_vm1, %v38_v14 }
  0x1f   :  { %1127 = vmatmul.mubr.f32.vlgmr.msra.gmra.mrb[0].mxu1 %v1372_v1  ;;  %1231 = vmatpush3.bf16.msra.mxu0 %v1442_v9 }
  0x20   :  { %1232 = vmatprep.subr.bf16.mxu0 %v1370_v0  ;;  %1137 = vmatprep.mubr.msk.f32.mxu0 %vm1371_vm0, %v1372_v1 }
  0x21   :  { %1237 = vmatpush3.bf16.msra.mxu1 %v1442_v9  ;;  %1148 = vmatprep.mubr.msk.f32.mxu1 %vm1371_vm0, %v1372_v1 }
  0x22   :  { %1238 = vmatprep.subr.bf16.mxu1 %v1370_v0 }
  0x23   :  { %1234 = vmatpush3.bf16.msra.mxu0 %v1446_v13 }
  0x24   :  { %1241 = vmatprep.subr.bf16.mxu0 %v1370_v0 }
  0x25   :  { %1240 = vmatpush3.bf16.msra.mxu1 %v1446_v13 }
  0x26   :  { %1247 = vmatprep.subr.bf16.mxu1 %v1370_v0 }
  0xf1   :  { %v120_v17 = vpop.f32.mrb[0].mxu0 }
  0xf2   :  { %v1472_v18 = vadd.f32 %v1047_v15, %v120_v17  ;;  %v1117_v19 = vpop.f32.mrb[1].mxu0  ;;  %v204_v20 = vpop.f32.mrb[0].mxu1 }
  0xf3   :  { %v1128_v21 = vpop.f32.mrb[1].mxu1 }
  0xf4   :  { %v208_v22 = vadd.f32 %v204_v20, %v1472_v18 }
  0xf6   :  { %1287 = vtanh.f32 %v208_v22 }
 0x100   :  { %v1288_v26 = vpop.eup %1287 }
 0x101   :  { %v210_v28 = vmul.f32 %v1288_v26, %v1475_v25 }
 0x103   :  { %v211_v29 = vadd.f32 %v210_v28, %v1477_v27 }
 0x105   :  { %214 = vrot.lane.b32.xlu0 %v211_v29, %s1374_s3  ;;  %v212_v32 = vmul.f32 0.0, %v211_v29 }
 0x177   :  { %v215_v30 = vpop.permute.xlu0 %214 }
 0x178   :  { %v217_v31 = vmul.f32 %v215_v30, %v211_v29 }
 0x17a   :  { %219 = vrot.lane.b32.xlu0 %v217_v31, %s1375_s20 }
 0x1ec   :  { %v220_v33 = vpop.permute.xlu0 %219 }
 0x1ed   :  { %v222_v34 = vadd.f32 %v220_v33, %v212_v32 }
 0x1ef   :  { %1289 = vtanh.f32 %v222_v34  ;;  %v312_v48 = vrot.slane %v222_v34, 7 }
 0x1f9   :  { %v1290_v35 = vpop.eup %1289 }
 0x1fa   :  { %225 = vrot.lane.b32.xlu1 %v1290_v35, %s1374_s3 }
 0x26c   :  { %v226_v36 = vpop.permute.xlu1 %225 }
 0x26d   :  { %v228_v37 = vmul.f32 %v226_v36, %v211_v29 }
 0x26f   :  { %230 = vrot.lane.b32.xlu1 %v228_v37, %s1375_s20 }
 0x2e1   :  { %v231_v38 = vpop.permute.xlu1 %230 }
 0x2e2   :  { %1138 = vmatmul.mubr.msk.f32.vlgmr.msra.gmra.mrb[2].mxu0 %vm50_vm1, %v231_v38 }
 0x2e3   :  { %1243 = vmatpush3.bf16.msra.mxu0 %v1442_v9  ;;  %1159 = vmatprep.mubr.msk.f32.mxu0 %vm1371_vm0, %v1372_v1 }
 0x2e4   :  { %1244 = vmatprep.subr.bf16.mxu0 %v1370_v0 }
 0x2e7   :  { %1246 = vmatpush3.bf16.msra.mxu0 %v1446_v13 }
 0x2e8   :  { %1253 = vmatprep.subr.bf16.mxu0 %v1370_v0 }
 0x3b5   :  { %v300_v39 = vpop.f32.mrb[2].mxu0 }
 0x3b6   :  { %v305_v40 = vrot.slane %v300_v39, 7  ;;  %v1139_v41 = vpop.f32.mrb[3].mxu0 }
 0x3b8   :  { %v307_v42 = vadd.f32 %v305_v40, %v1472_v18 }
 0x3ba   :  { %1291 = vtanh.f32 %v307_v42 }
 0x3c4   :  { %v1292_v43 = vpop.eup %1291 }
 0x3c5   :  { %v309_v44 = vmul.f32 %v1292_v43, %v1475_v25 }
 0x3c7   :  { %v310_v45 = vadd.f32 %v309_v44, %v1477_v27 }
 0x3c9   :  { %316 = vrot.lane.b32.xlu0 %v310_v45, %s1374_s3  ;;  %v314_v49 = vmul.f32 %v312_v48, %v310_v45 }
 0x43b   :  { %v317_v46 = vpop.permute.xlu0 %316 }
 0x43c   :  { %v319_v47 = vmul.f32 %v317_v46, %v310_v45 }
 0x43e   :  { %321 = vrot.lane.b32.xlu1 %v319_v47, %s1375_s20 }
 0x4b0   :  { %v322_v50 = vpop.permute.xlu1 %321 }
 0x4b1   :  { %v324_v51 = vadd.f32 %v322_v50, %v314_v49 }
 0x4b3   :  { %1293 = vtanh.f32 %v324_v51  ;;  %v415_v4 = vrot.slane %v324_v51, 7 }
 0x4bd   :  { %v1294_v52 = vpop.eup %1293 }
 0x4be   :  { %327 = vrot.lane.b32.xlu0 %v1294_v52, %s1374_s3 }
 0x530   :  { %v328_v53 = vpop.permute.xlu0 %327 }
 0x531   :  { %v330_v54 = vmul.f32 %v328_v53, %v310_v45 }
 0x533   :  { %v332_v55 = vrot.slane %v330_v54, 1 }
 0x535   :  { %333 = vrot.lane.b32.xlu1 %v332_v55, %s1375_s20 }
 0x5a7   :  { %v334_v56 = vpop.permute.xlu1 %333 }
 0x5a8   :  { %1149 = vmatmul.mubr.msk.f32.vlgmr.msra.gmra.mrb[2].mxu1 %vm50_vm1, %v334_v56 }
 0x5a9   :  { %1249 = vmatpush3.bf16.msra.mxu1 %v1442_v9  ;;  %1170 = vmatprep.mubr.msk.f32.mxu1 %vm1371_vm0, %v1372_v1 }
 0x5aa   :  { %1250 = vmatprep.subr.bf16.mxu1 %v1370_v0 }
 0x5ad   :  { %1252 = vmatpush3.bf16.msra.mxu1 %v1446_v13 }
 0x5ae   :  { %1259 = vmatprep.subr.bf16.mxu1 %v1370_v0 }
 0x67b   :  { %v403_v57 = vpop.f32.mrb[2].mxu1 }
 0x67c   :  { %v408_v58 = vrot.slane %v403_v57, 6  ;;  %v1150_v59 = vpop.f32.mrb[3].mxu1 }
 0x67e   :  { %v410_v60 = vadd.f32 %v408_v58, %v1472_v18 }
 0x680   :  { %1295 = vtanh.f32 %v410_v60 }
 0x68a   :  { %v1296_v61 = vpop.eup %1295 }
 0x68b   :  { %v412_v62 = vmul.f32 %v1296_v61, %v1475_v25 }
 0x68d   :  { %v413_v63 = vadd.f32 %v412_v62, %v1477_v27 }
 0x68f   :  { %419 = vrot.lane.b32.xlu0 %v413_v63, %s1374_s3  ;;  %v417_v5 = vmul.f32 %v415_v4, %v413_v63 }
 0x701   :  { %v420_v2 = vpop.permute.xlu0 %419 }
 0x702   :  { %v422_v3 = vmul.f32 %v420_v2, %v413_v63 }
 0x704   :  { %424 = vrot.lane.b32.xlu1 %v422_v3, %s1375_s20 }
 0x776   :  { %v425_v6 = vpop.permute.xlu1 %424 }
 0x777   :  { %v427_v7 = vadd.f32 %v425_v6, %v417_v5 }
 0x779   :  { %1297 = vtanh.f32 %v427_v7  ;;  %v518_v26 = vrot.slane %v427_v7, 7 }
 0x783   :  { %v1298_v8 = vpop.eup %1297 }
 0x784   :  { %430 = vrot.lane.b32.xlu0 %v1298_v8, %s1374_s3 }
 0x7f6   :  { %v431_v10 = vpop.permute.xlu0 %430 }
 0x7f7   :  { %v433_v11 = vmul.f32 %v431_v10, %v413_v63 }
 0x7f9   :  { %v435_v12 = vrot.slane %v433_v11, 2 }
 0x7fb   :  { %436 = vrot.lane.b32.xlu1 %v435_v12, %s1375_s20 }
 0x86d   :  { %v437_v14 = vpop.permute.xlu1 %436 }
 0x86e   :  { %1160 = vmatmul.mubr.msk.f32.vlgmr.msra.gmra.mrb[4].mxu0 %vm50_vm1, %v437_v14 }
 0x86f   :  { %1255 = vmatpush3.bf16.msra.mxu0 %v1442_v9  ;;  %1181 = vmatprep.mubr.msk.f32.mxu0 %vm1371_vm0, %v1372_v1 }
 0x870   :  { %1256 = vmatprep.subr.bf16.mxu0 %v1370_v0 }
 0x873   :  { %1258 = vmatpush3.bf16.msra.mxu0 %v1446_v13 }
 0x874   :  { %1265 = vmatprep.subr.bf16.mxu0 %v1370_v0 }
 0x941   :  { %v506_v15 = vpop.f32.mrb[4].mxu0 }
 0x942   :  { %v511_v16 = vrot.slane %v506_v15, 5  ;;  %v1161_v17 = vpop.f32.mrb[5].mxu0 }
 0x944   :  { %v513_v19 = vadd.f32 %v511_v16, %v1472_v18 }
 0x946   :  { %1299 = vtanh.f32 %v513_v19 }
 0x950   :  { %v1300_v20 = vpop.eup %1299 }
 0x951   :  { %v515_v21 = vmul.f32 %v1300_v20, %v1475_v25 }
 0x953   :  { %v516_v22 = vadd.f32 %v515_v21, %v1477_v27 }
 0x955   :  { %522 = vrot.lane.b32.xlu0 %v516_v22, %s1374_s3  ;;  %v520_v28 = vmul.f32 %v518_v26, %v516_v22 }
 0x9c7   :  { %v523_v23 = vpop.permute.xlu0 %522 }
 0x9c8   :  { %v525_v24 = vmul.f32 %v523_v23, %v516_v22 }
 0x9ca   :  { %527 = vrot.lane.b32.xlu1 %v525_v24, %s1375_s20 }
 0xa3c   :  { %v528_v29 = vpop.permute.xlu1 %527 }
 0xa3d   :  { %v530_v30 = vadd.f32 %v528_v29, %v520_v28 }
 0xa3f   :  { %1301 = vtanh.f32 %v530_v30  ;;  %v621_v45 = vrot.slane %v530_v30, 7 }
 0xa49   :  { %v1302_v31 = vpop.eup %1301 }
 0xa4a   :  { %533 = vrot.lane.b32.xlu0 %v1302_v31, %s1374_s3 }
 0xabc   :  { %v534_v32 = vpop.permute.xlu0 %533 }
 0xabd   :  { %v536_v33 = vmul.f32 %v534_v32, %v516_v22 }
 0xabf   :  { %v538_v34 = vrot.slane %v536_v33, 3 }
 0xac1   :  { %539 = vrot.lane.b32.xlu1 %v538_v34, %s1375_s20 }
 0xb33   :  { %v540_v35 = vpop.permute.xlu1 %539 }
 0xb34   :  { %1171 = vmatmul.mubr.msk.f32.vlgmr.msra.gmra.mrb[4].mxu1 %vm50_vm1, %v540_v35 }
 0xb35   :  { %1261 = vmatpush3.bf16.msra.mxu1 %v1442_v9  ;;  %1192 = vmatprep.mubr.msk.f32.mxu1 %vm1371_vm0, %v1372_v1 }
 0xb36   :  { %1262 = vmatprep.subr.bf16.mxu1 %v1370_v0 }
 0xb39   :  { %1264 = vmatpush3.bf16.msra.mxu1 %v1446_v13 }
 0xb3a   :  { %1271 = vmatprep.subr.bf16.mxu1 %v1370_v0 }
 0xc07   :  { %v609_v36 = vpop.f32.mrb[4].mxu1 }
 0xc08   :  { %v614_v37 = vrot.slane %v609_v36, 4  ;;  %v1172_v38 = vpop.f32.mrb[5].mxu1 }
 0xc0a   :  { %v616_v39 = vadd.f32 %v614_v37, %v1472_v18 }
 0xc0c   :  { %1303 = vtanh.f32 %v616_v39 }
 0xc16   :  { %v1304_v40 = vpop.eup %1303 }
 0xc17   :  { %v618_v41 = vmul.f32 %v1304_v40, %v1475_v25 }
 0xc19   :  { %v619_v42 = vadd.f32 %v618_v41, %v1477_v27 }
 0xc1b   :  { %625 = vrot.lane.b32.xlu0 %v619_v42, %s1374_s3  ;;  %v623_v46 = vmul.f32 %v621_v45, %v619_v42 }
 0xc8d   :  { %v626_v43 = vpop.permute.xlu0 %625 }
 0xc8e   :  { %v628_v44 = vmul.f32 %v626_v43, %v619_v42 }
 0xc90   :  { %630 = vrot.lane.b32.xlu1 %v628_v44, %s1375_s20  ;;  %v952_v44 = vld [vmem:[%s1605_s4 + $0x18] sm:$0xff] }
 0xd02   :  { %v631_v47 = vpop.permute.xlu1 %630 }
 0xd03   :  { %v633_v48 = vadd.f32 %v631_v47, %v623_v46 }
 0xd05   :  { %1305 = vtanh.f32 %v633_v48  ;;  %v724_v62 = vrot.slane %v633_v48, 7 }
 0xd0f   :  { %v1306_v49 = vpop.eup %1305 }
 0xd10   :  { %636 = vrot.lane.b32.xlu0 %v1306_v49, %s1374_s3 }
 0xd82   :  { %v637_v50 = vpop.permute.xlu0 %636 }
 0xd83   :  { %v639_v51 = vmul.f32 %v637_v50, %v619_v42 }
 0xd85   :  { %v641_v52 = vrot.slane %v639_v51, 4  ;;  %v953_v51 = vld [vmem:[%s1606_s5] sm:$0x1] }
 0xd87   :  { %642 = vrot.lane.b32.xlu1 %v641_v52, %s1375_s20 }
 0xdf9   :  { %v643_v53 = vpop.permute.xlu1 %642 }
 0xdfa   :  { %1182 = vmatmul.mubr.msk.f32.vlgmr.msra.gmra.mrb[6].mxu0 %vm50_vm1, %v643_v53 }
 0xdfb   :  { %1267 = vmatpush3.bf16.msra.mxu0 %v1442_v9  ;;  %1203 = vmatprep.mubr.msk.f32.mxu0 %vm1371_vm0, %v1372_v1 }
 0xdfc   :  { %1268 = vmatprep.subr.bf16.mxu0 %v1370_v0 }
 0xdff   :  { %1270 = vmatpush3.bf16.msra.mxu0 %v1446_v13 }
 0xecd   :  { %v712_v54 = vpop.f32.mrb[6].mxu0 }
 0xece   :  { %v717_v55 = vrot.slane %v712_v54, 3  ;;  %v1183_v56 = vpop.f32.mrb[7].mxu0 }
 0xed0   :  { %v719_v57 = vadd.f32 %v717_v55, %v1472_v18 }
 0xed2   :  { %1307 = vtanh.f32 %v719_v57 }
 0xedc   :  { %v1308_v58 = vpop.eup %1307 }
 0xedd   :  { %v721_v59 = vmul.f32 %v1308_v58, %v1475_v25 }
 0xedf   :  { %v722_v60 = vadd.f32 %v721_v59, %v1477_v27 }
 0xee1   :  { %728 = vrot.lane.b32.xlu0 %v722_v60, %s1374_s3  ;;  %v726_v63 = vmul.f32 %v724_v62, %v722_v60 }
 0xf53   :  { %v729_v9 = vpop.permute.xlu0 %728 }
 0xf54   :  { %v731_v61 = vmul.f32 %v729_v9, %v722_v60 }
 0xf56   :  { %733 = vrot.lane.b32.xlu1 %v731_v61, %s1375_s20 }
 0xfc8   :  { %v734_v13 = vpop.permute.xlu1 %733 }
 0xfc9   :  { %v736_v2 = vadd.f32 %v734_v13, %v726_v63 }
 0xfcb   :  { %1309 = vtanh.f32 %v736_v2  ;;  %v827_v20 = vrot.slane %v736_v2, 7 }
 0xfd5   :  { %v1310_v3 = vpop.eup %1309 }
 0xfd6   :  { %739 = vrot.lane.b32.xlu0 %v1310_v3, %s1374_s3 }
0x1048   :  { %v740_v4 = vpop.permute.xlu0 %739 }
0x1049   :  { %v742_v5 = vmul.f32 %v740_v4, %v722_v60 }
0x104b   :  { %v744_v6 = vrot.slane %v742_v5, 5 }
0x104d   :  { %745 = vrot.lane.b32.xlu1 %v744_v6, %s1375_s20 }
0x10bf   :  { %v746_v7 = vpop.permute.xlu1 %745 }
0x10c0   :  { %1193 = vmatmul.mubr.msk.f32.vlgmr.msra.gmra.mrb[6].mxu1 %vm50_vm1, %v746_v7 }
0x10c1   :  { %1214 = vmatprep.mubr.msk.f32.mxu1 %vm1371_vm0, %v1372_v1 }
0x1193   :  { %v815_v8 = vpop.f32.mrb[6].mxu1 }
0x1194   :  { %v820_v10 = vrot.slane %v815_v8, 2  ;;  %v1194_v11 = vpop.f32.mrb[7].mxu1 }
0x1196   :  { %v822_v12 = vadd.f32 %v820_v10, %v1472_v18 }
0x1198   :  { %1311 = vtanh.f32 %v822_v12 }
0x11a2   :  { %v1312_v14 = vpop.eup %1311 }
0x11a3   :  { %v824_v15 = vmul.f32 %v1312_v14, %v1475_v25 }
0x11a5   :  { %v825_v16 = vadd.f32 %v824_v15, %v1477_v27 }
0x11a7   :  { %831 = vrot.lane.b32.xlu0 %v825_v16, %s1374_s3  ;;  %v829_v21 = vmul.f32 %v827_v20, %v825_v16 }
0x1219   :  { %v832_v17 = vpop.permute.xlu0 %831 }
0x121a   :  { %v834_v19 = vmul.f32 %v832_v17, %v825_v16 }
0x121c   :  { %836 = vrot.lane.b32.xlu1 %v834_v19, %s1375_s20 }
0x128e   :  { %v837_v1 = vpop.permute.xlu1 %836 }
0x128f   :  { %v839_v22 = vadd.f32 %v837_v1, %v829_v21 }
0x1291   :  { %1313 = vtanh.f32 %v839_v22  ;;  %v930_v39 = vrot.slane %v839_v22, 7 }
0x129b   :  { %v1314_v23 = vpop.eup %1313 }
0x129c   :  { %842 = vrot.lane.b32.xlu0 %v1314_v23, %s1374_s3 }
0x130e   :  { %v843_v24 = vpop.permute.xlu0 %842 }
0x130f   :  { %v845_v26 = vmul.f32 %v843_v24, %v825_v16 }
0x1311   :  { %v847_v28 = vrot.slane %v845_v26, 6 }
0x1313   :  { %848 = vrot.lane.b32.xlu1 %v847_v28, %s1375_s20 }
0x1385   :  { %v849_v29 = vpop.permute.xlu1 %848 }
0x1386   :  { %1204 = vmatmul.mubr.msk.f32.vlgmr.msra.gmra.mrb[8].mxu0 %vm50_vm1, %v849_v29 }
0x1459   :  { %v918_v30 = vpop.f32.mrb[8].mxu0 }
0x145a   :  { %v923_v31 = vrot.slane %v918_v30, 1  ;;  %v1205_v32 = vpop.f32.mrb[9].mxu0 }
0x145c   :  { %v925_v33 = vadd.f32 %v923_v31, %v1472_v18  ;;  %v949_v18 = vld [vmem:[%s1605_s4] sm:$0xff] }
0x145e   :  { %1315 = vtanh.f32 %v925_v33 }
0x1468   :  { %v1316_v34 = vpop.eup %1315 }
0x1469   :  { %v927_v35 = vmul.f32 %v1316_v34, %v1475_v25  ;;  %v950_v25 = vld [vmem:[%s1605_s4 + $0x8] sm:$0xff] }
0x146a   :  { %v1272_v43 = vpack.c.bf16 %v950_v25, %v949_v18 }
0x146b   :  { %v928_v36 = vadd.f32 %v927_v35, %v1477_v27  ;;  %v951_v27 = vld [vmem:[%s1605_s4 + $0x10] sm:$0xff]  ;;  %s1376_s4 = smov [#allocation5]  }
0x146c   :  { %1273 = vmatpush3.bf16.msra.mxu1 %v1272_v43  ;;  %v1275_v45 = vpack.c.bf16 %v952_v44, %v951_v27  ;;  %s1038_s7 = sshll.u32 %s1376_s4, 4  ;;  %s1039_s7 = int_to_ptr.vmem [resolvable:$true] %s1038_s7 }
0x146d   :  { %934 = vrot.lane.b32.xlu0 %v928_v36, %s1374_s3  ;;  %v932_v40 = vmul.f32 %v930_v39, %v928_v36  ;;  %1274 = vmatprep.subr.bf16.mxu1 %v1370_v0  ;;  %s1341_s8 = scalar_lea.vmem %s1039_s7, 16  ;;  %s1345_s9 = scalar_lea.vmem %s1039_s7, 32 }
0x146e   :  { %p1342_p8 = scmp.ne.s32.totalorder %s1039_s7, %s1341_s8  ;;  %p1346_p9 = scmp.lt.s32.totalorder %s1039_s7, %s1039_s7 }
0x146f   :  { %p1347_p10 = scmp.lt.s32.totalorder %s1345_s9, %s1341_s8 }
0x1470   :  { %1276 = vmatpush3.bf16.msra.mxu1 %v1275_v45 }
0x1471   :  { %p1348_p11 = por %p1347_p10, %p1346_p9 }
0x1473   :  { %p1349_p12 = pnand %p1348_p11, %p1342_p8 }
0x14df   :  { %v935_v37 = vpop.permute.xlu0 %934 }
0x14e0   :  { %v937_v38 = vmul.f32 %v935_v37, %v928_v36 }
0x14e2   :  { %939 = vrot.lane.b32.xlu1 %v937_v38, %s1375_s20 }
0x1554   :  { %v940_v41 = vpop.permute.xlu1 %939 }
0x1555   :  { %v942_v42 = vadd.f32 %v940_v41, %v932_v40 }
0x1557   :  { %1317 = vtanh.f32 %v942_v42 }
0x1561   :  { %v1318_v46 = vpop.eup %1317 }
0x1562   :  { %945 = vrot.lane.b32.xlu0 %v1318_v46, %s1374_s3 }
0x15d4   :  { %v946_v47 = vpop.permute.xlu0 %945 }
0x15d5   :  { %v948_v48 = vmul.f32 %v946_v47, %v928_v36 }
0x15d7   :  { %v955_v49 = vrot.slane %v948_v48, 7 }
0x15d9   :  { %956 = vrot.lane.b32.xlu1 %v955_v49, %s1375_s20 }
0x164b   :  { %v957_v50 = vpop.permute.xlu1 %956 }
0x164c   :  { %1215 = vmatmul.mubr.msk.f32.vlgmr.msra.gmra.mrb[8].mxu1 %vm50_vm1, %v957_v50 }
0x171f   :  { %v1026_v52 = vpop.f32.mrb[8].mxu1 }
0x1720   :  { %v1027_v0 = vadd.f32 %v1026_v52, %v953_v51  ;;  %v1216_v53 = vpop.f32.mrb[9].mxu1 }
0x1722   :  { %1031 = vst.msk [vmem:[#allocation5] sm:$0x1] %vm1030_vm5, %v1027_v0 }
0x1723   :  { %1352 = shalt.err (!%p1349_p12)
}
0x1724   :  { %s1353_s5 = scalar_lea.hbm %s1607_s6, 16 }
0x1725   :  { %p1354_p13 = scmp.ne.s32.totalorder %s1607_s6, %s1353_s5  ;;  %p1357_p0 = scmp.lt.u32.totalorder %s1353_s5, %s1607_s6 }
0x1727   :  { %p1359_p1 = pnand %p1357_p0, %p1354_p13 }
0x1729   :  { %1362 = shalt.err (!%p1359_p1)
}
0x172a   :  { %1041 = dma.vmem_to_hbm [thread:$0]  %s1039_s7, 16, %s1607_s6, [#allocation4]  }
0x172b   :  { %1365 = dma.done.wait [#allocation4], 16  }
0x172c   :  { %1366 = vsyncadd [#allocation4], 4294967280 }
0x172d   :  { %1045 = vsyncpa [#allocation3], 1 }
0x172e   :  { %1046 = vsyncpa [#allocation4], 1 }

</bundles_post_ra>
